<compile_context>
chip_gen: v6e
topology: v6e:2x2x1
jax: 0.10.0
libtpu: 0.0.40
codegen_flags: <defaults>
</compile_context>

<pallas_src>
import jax
import jax.numpy as jnp
from jax import lax
from jax.experimental import pallas as pl
from jax.experimental.pallas import tpu as pltpu


def attention_decoder_kernel(
    xch_ref,     # (1, 3H) f32   packed state row [x_embedded | last_context | last_hidden]
    enc_ref,     # (S, H)  bf16  encoder outputs
    ve_ref,      # (1, H)  bf16  folded attention vector  v_e = W_a[:, H:]^T @ other
    wg_ref,      # (3H, 6H) bf16 block-diag fused GRU weight [[W_ih^T, 0], [0, W_hh^T]]
    bg_ref,      # (1, 6H) f32   [b_ih | b_hh]
    wo_ref,      # (2H, TN) bf16 output-projection tile (rows [0:H]=dec_out, [H:2H]=context)
    bo_ref,      # (1, TN) f32   output-bias tile (vocab-pad columns hold -1e30)
    logits_ref,  # (1, TN) f32   raw logits tile (lse subtracted in the wrapper)
    lse_ref,     # (1, 1)  f32   log-sum-exp over the full padded vocab
    ctx_ref,     # (1, H)  f32   new context
    hid_ref,     # (1, H)  f32   new hidden
    attw_ref,    # (1, S)  f32   attention weights (lane-dense)
    hc_sc,       # VMEM (1, 2H) bf16 scratch: [h_new | ctx], reused by every vocab tile
    m_sc,        # VMEM (1, 1) f32 running max
    l_sc,        # VMEM (1, 1) f32 running sum-exp
):
    H = hid_ref.shape[1]
    j = pl.program_id(0)

    # ---- decode-step prologue: GRU cell + attention + context (vocab tile 0 only) ----
    @pl.when(j == 0)
    def _prologue():
        xch = xch_ref[...]                               # (1, 3H) f32
        h0 = xch[:, 2 * H:3 * H]                         # (1, H)

        # Fused GRU mat-vec: [gi | gh] = [x | ctx | h] @ W_blockdiag + [b_ih | b_hh]
        g = jnp.dot(xch.astype(jnp.bfloat16), wg_ref[...],
                    preferred_element_type=jnp.float32) + bg_ref[...]       # (1, 6H)
        gi = g[:, 0:3 * H]
        gh = g[:, 3 * H:6 * H]
        r = jax.nn.sigmoid(gi[:, 0:H] + gh[:, 0:H])
        z = jax.nn.sigmoid(gi[:, H:2 * H] + gh[:, H:2 * H])
        n = jnp.tanh(gi[:, 2 * H:3 * H] + r * gh[:, 2 * H:3 * H])
        h_new = (1.0 - z) * n + z * h0                                      # (1, H)

        # Attention (method='concat'), folded score path:
        #   score_i = other . (W_a @ [h_new; enc_i] + b_a) = enc_i . v_e + const
        # const drops under softmax. Transposed contraction -> lane-dense (1, S), no enc^T copy.
        enc = enc_ref[...]                                                  # (S, H) bf16
        scores = lax.dot_general(ve_ref[...], enc, (((1,), (1,)), ((), ())),
                                 preferred_element_type=jnp.float32)        # (1, S)
        mval = jnp.max(scores, axis=1, keepdims=True)
        ex = jnp.exp(scores - mval)
        attw = ex * pl.reciprocal(jnp.sum(ex, axis=1, keepdims=True), approx=True)
        attw_ref[...] = attw

        # context = attn_weights @ encoder_outputs  (MXU)
        ctx = jnp.dot(attw.astype(jnp.bfloat16), enc,
                      preferred_element_type=jnp.float32)                   # (1, H)
        ctx_ref[...] = ctx
        hid_ref[...] = h_new
        hc_sc[...] = jnp.concatenate([h_new, ctx], axis=1).astype(jnp.bfloat16)
        m_sc[...] = jnp.full_like(m_sc, -jnp.inf)
        l_sc[...] = jnp.zeros_like(l_sc)

    # ---- streamed output projection tile + online log-sum-exp ----
    logits = jnp.dot(hc_sc[...], wo_ref[...],
                     preferred_element_type=jnp.float32) + bo_ref[...]      # (1, TN)
    logits_ref[...] = logits
    m_prev = m_sc[...]
    m_new = jnp.maximum(m_prev, jnp.max(logits, axis=1, keepdims=True))
    l_sc[...] = (l_sc[...] * jnp.exp(m_prev - m_new)
                 + jnp.sum(jnp.exp(logits - m_new), axis=1, keepdims=True))
    m_sc[...] = m_new

    @pl.when(j == pl.num_programs(0) - 1)
    def _epilogue():
        lse_ref[...] = m_sc[...] + jnp.log(l_sc[...])


def attention_decoder_forward(params, word_input, last_context, last_hidden, encoder_outputs):
    """Mirrors AttentionDecoder.forward.

    word_input: () int32 token id
    last_context: (1, H)
    last_hidden: (1, 1, H)
    encoder_outputs: (S, 1, H)
    returns (log_probs (1, V), context (1, H), hidden (1, 1, H), attn_weights (1, 1, S))
    """
    H = params["hidden_size"]
    V = params["n_words"]
    E = params["embedding_size"]
    S = encoder_outputs.shape[0]
    TN = params["tile_n"]
    Vp = params["wo"].shape[1]
    n_tiles = Vp // TN

    # wrapper-side glue (layout plumbing only)
    x_emb = params["embedding"][word_input].reshape(1, E)
    h0 = last_hidden.reshape(1, H)
    xch = jnp.concatenate([x_emb, last_context, h0], axis=1).astype(jnp.float32)   # (1, 3H)
    enc = encoder_outputs.reshape(S, H).astype(jnp.bfloat16)                       # (S, H)

    inputs = (xch, enc, params["v_e"], params["wg"], params["bg"], params["wo"], params["bo"])

    in_specs = [
        pl.BlockSpec((1, 3 * H), lambda j: (0, 0)),      # xch   (resident)
        pl.BlockSpec((S, H), lambda j: (0, 0)),          # enc   (resident)
        pl.BlockSpec((1, H), lambda j: (0, 0)),          # v_e   (resident)
        pl.BlockSpec((3 * H, 6 * H), lambda j: (0, 0)),  # wg    (resident)
        pl.BlockSpec((1, 6 * H), lambda j: (0, 0)),      # bg    (resident)
        pl.BlockSpec((2 * H, TN), lambda j: (0, j)),     # wo    (streamed over vocab tiles)
        pl.BlockSpec((1, TN), lambda j: (0, j)),         # bo    (streamed over vocab tiles)
    ]
    out_shapes = (
        jax.ShapeDtypeStruct((1, Vp), jnp.float32),      # raw logits (lane-padded vocab)
        jax.ShapeDtypeStruct((1, 1), jnp.float32),       # lse
        jax.ShapeDtypeStruct((1, H), jnp.float32),       # context
        jax.ShapeDtypeStruct((1, H), jnp.float32),       # new hidden
        jax.ShapeDtypeStruct((1, S), jnp.float32),       # attention weights
    )
    out_specs = (
        pl.BlockSpec((1, TN), lambda j: (0, j)),
        pl.BlockSpec((1, 1), lambda j: (0, 0)),
        pl.BlockSpec((1, H), lambda j: (0, 0)),
        pl.BlockSpec((1, H), lambda j: (0, 0)),
        pl.BlockSpec((1, S), lambda j: (0, 0)),
    )
    scratch_shapes = [
        pltpu.VMEM((1, 2 * H), jnp.bfloat16),            # [h_new | ctx] for the logits dots
        pltpu.VMEM((1, 1), jnp.float32),                 # running max
        pltpu.VMEM((1, 1), jnp.float32),                 # running sum-exp
    ]

    # VMEM budget: double-buffered streamed tiles + resident small blocks + margin.
    # (On v7x keep TN such that this stays well under 64 MiB; v5e/v6e allow up to 128 MiB.)
    vmem_bytes = int(
        2 * (2 * H * TN * 2 + TN * 4 + TN * 4)                               # wo/bo/logits tiles
        + (3 * H * 4 + S * H * 2 + H * 2 + 3 * H * 6 * H * 2 + 6 * H * 4)    # resident inputs
        + (4 + 2 * H * 4 + S * 4)                                            # resident outputs
        + (2 * H * 2 + 8)                                                    # scratch
        + (1 << 20)
    )
    vmem_bytes = max(vmem_bytes, 8 << 20)

    logits, lse, ctx, hid, attw = pl.pallas_call(
        attention_decoder_kernel,
        out_shape=out_shapes,
        grid_spec=pltpu.PrefetchScalarGridSpec(
            num_scalar_prefetch=0,
            grid=(n_tiles,),
            in_specs=in_specs,
            out_specs=out_specs,
            scratch_shapes=scratch_shapes,
        ),
        compiler_params=pltpu.CompilerParams(
            dimension_semantics=("arbitrary",),   # running (m, l) carried across vocab tiles
            vmem_limit_bytes=vmem_bytes,
        ),
    )(*inputs)

    logp = (logits - lse)[:, :V]                 # one cheap elementwise pass; pad sliced off
    return logp, ctx, hid.reshape(1, 1, H), attw.reshape(1, 1, S)


def init_params(key, n_words, embedding_size, hidden_size, tile_n=512):
    assert embedding_size == hidden_size, "module's forward requires embedding_size == hidden_size"
    H, E, V = hidden_size, embedding_size, n_words
    ks = jax.random.split(key, 10)
    scale = 0.1
    emb = scale * jax.random.normal(ks[0], (V, E), jnp.float32)
    W_ih = scale * jax.random.normal(ks[1], (3 * H, 2 * H), jnp.float32)
    b_ih = scale * jax.random.normal(ks[2], (3 * H,), jnp.float32)
    W_hh = scale * jax.random.normal(ks[3], (3 * H, H), jnp.float32)
    b_hh = scale * jax.random.normal(ks[4], (3 * H,), jnp.float32)
    W_a = scale * jax.random.normal(ks[5], (H, 2 * H), jnp.float32)   # attn Linear(2H -> H)
    b_a = scale * jax.random.normal(ks[6], (H,), jnp.float32)
    other = scale * jax.random.normal(ks[7], (H,), jnp.float32)
    W_o = scale * jax.random.normal(ks[8], (V, 2 * H), jnp.float32)   # out Linear(2H -> V)
    b_o = scale * jax.random.normal(ks[9], (V,), jnp.float32)

    # ---- kernel-ready fused / folded forms ----
    TN = 128 * max(1, int(tile_n) // 128)            # lane-dense vocab tile (multiple of 128)
    Vp = TN * ((V + TN - 1) // TN)                   # pad vocab to a multiple of the tile

    wo = jnp.zeros((2 * H, Vp), jnp.bfloat16).at[:, :V].set(W_o.T.astype(jnp.bfloat16))
    bo = jnp.full((1, Vp), -1e30, jnp.float32).at[0, :V].set(b_o)
    v_e = (W_a[:, H:].T @ other).reshape(1, H).astype(jnp.bfloat16)   # folded score vector
    wg = jnp.zeros((3 * H, 6 * H), jnp.float32)
    wg = wg.at[0:2 * H, 0:3 * H].set(W_ih.T)         # [x | ctx] rows -> gi columns
    wg = wg.at[2 * H:3 * H, 3 * H:6 * H].set(W_hh.T)  # h rows -> gh columns
    wg = wg.astype(jnp.bfloat16)
    bg = jnp.concatenate([b_ih, b_hh]).reshape(1, 6 * H)

    return dict(
        hidden_size=H, embedding_size=E, n_words=V, tile_n=TN,
        embedding=emb,
        # raw (PyTorch-style) params, kept for the reference check
        W_ih=W_ih, b_ih=b_ih, W_hh=W_hh, b_hh=b_hh,
        W_a=W_a, b_a_vec=b_a, other_vec=other, W_o=W_o, b_o_vec=b_o,
        # kernel-ready
        v_e=v_e,          # (1, H)  bf16
        wg=wg,            # (3H, 6H) bf16 block-diag fused GRU weight
        bg=bg,            # (1, 6H) f32
        wo=wo,            # (2H, Vp) bf16
        bo=bo,            # (1, Vp) f32 (-1e30 in pad columns)
    )


def reference_forward(params, word_input, last_context, last_hidden, encoder_outputs):
    """Pure-JAX f32 replica of the PyTorch forward, for the correctness check."""
    H, E = params["hidden_size"], params["embedding_size"]
    S = encoder_outputs.shape[0]
    x_emb = params["embedding"][word_input].reshape(1, E)
    h0 = last_hidden.reshape(1, H)
    enc = encoder_outputs.reshape(S, H)

    x = jnp.concatenate([x_emb, last_context], axis=1)
    gi = x @ params["W_ih"].T + params["b_ih"]
    gh = h0 @ params["W_hh"].T + params["b_hh"]
    r = jax.nn.sigmoid(gi[:, :H] + gh[:, :H])
    z = jax.nn.sigmoid(gi[:, H:2 * H] + gh[:, H:2 * H])
    n = jnp.tanh(gi[:, 2 * H:] + r * gh[:, 2 * H:])
    h_new = (1.0 - z) * n + z * h0

    cat = jnp.concatenate([jnp.broadcast_to(h_new, (S, H)), enc], axis=1)
    energy = cat @ params["W_a"].T + params["b_a_vec"]
    scores = energy @ params["other_vec"]
    w = jax.nn.softmax(scores)
    ctx = (w[None, :] @ enc)
    logits = jnp.concatenate([h_new, ctx], axis=1) @ params["W_o"].T + params["b_o_vec"]
    logp = jax.nn.log_softmax(logits, axis=1)
    return logp, ctx, h_new.reshape(1, 1, H), w.reshape(1, 1, S)


if __name__ == "__main__":
    n_words = 64
    hidden_size = 32
    embedding_size = 32   # must equal hidden_size (GRU input_size = 2*hidden_size)
    max_length = 8        # encoder sequence length

    key = jax.random.PRNGKey(0)
    k_par, k_ctx, k_hid, k_enc = jax.random.split(key, 4)
    params = init_params(k_par, n_words, embedding_size, hidden_size)

    word_input = jnp.array(3, dtype=jnp.int32)
    last_context = 0.1 * jax.random.normal(k_ctx, (1, hidden_size), jnp.float32)
    last_hidden = 0.1 * jax.random.normal(k_hid, (1, 1, hidden_size), jnp.float32)
    encoder_outputs = 0.1 * jax.random.normal(k_enc, (max_length, 1, hidden_size), jnp.float32)

    # pure-JAX f32 reference of the PyTorch forward (computed first)
    ref = reference_forward(params, word_input, last_context, last_hidden, encoder_outputs)
    ref = jax.block_until_ready(ref)

    outs = attention_decoder_forward(params, word_input, last_context, last_hidden, encoder_outputs)
    outs = jax.block_until_ready(outs)

    # bf16 matmul operands + approx reciprocal vs f32 reference -> loose tolerance
    for got, want in zip(outs, ref):
        assert got.shape == want.shape, (got.shape, want.shape)
        err = float(jnp.max(jnp.abs(got - want)))
        assert jnp.allclose(got, want, atol=2e-2, rtol=2e-2), err

    print("KERNEL_OK")
</pallas_src>

<mosaic_0001>
module attributes {stable_mosaic.version = 11 : i64} {
  func.func @attention_decoder_kernel(%arg0: i32, %arg1: memref<1x96xf32, #tpu.memory_space<vmem>>, %arg2: memref<8x32xbf16, #tpu.memory_space<vmem>>, %arg3: memref<1x32xbf16, #tpu.memory_space<vmem>>, %arg4: memref<96x192xbf16, #tpu.memory_space<vmem>>, %arg5: memref<1x192xf32, #tpu.memory_space<vmem>>, %arg6: memref<64x512xbf16, #tpu.memory_space<vmem>>, %arg7: memref<1x512xf32, #tpu.memory_space<vmem>>, %arg8: memref<1x512xf32, #tpu.memory_space<vmem>>, %arg9: memref<1x1xf32, #tpu.memory_space<vmem>>, %arg10: memref<1x32xf32, #tpu.memory_space<vmem>>, %arg11: memref<1x32xf32, #tpu.memory_space<vmem>>, %arg12: memref<1x8xf32, #tpu.memory_space<vmem>>, %arg13: memref<1x64xbf16, #tpu.memory_space<vmem>>, %arg14: memref<1x1xf32, #tpu.memory_space<vmem>>, %arg15: memref<1x1xf32, #tpu.memory_space<vmem>>) attributes {dimension_semantics = [#tpu.dimension_semantics<arbitrary>], iteration_bounds = array<i64: 1>, scalar_prefetch = 0 : i64, scratch_operands = 3 : i64, tpu.core_type = #tpu.core_type<tc>, window_params = [{pipeline_mode = #tpu.pipeline_mode<synchronous>, transform_indices = @transform_0, window_bounds = array<i64: 1, 96>}, {pipeline_mode = #tpu.pipeline_mode<synchronous>, transform_indices = @transform_1, window_bounds = array<i64: 8, 32>}, {pipeline_mode = #tpu.pipeline_mode<synchronous>, transform_indices = @transform_2, window_bounds = array<i64: 1, 32>}, {pipeline_mode = #tpu.pipeline_mode<synchronous>, transform_indices = @transform_3, window_bounds = array<i64: 96, 192>}, {pipeline_mode = #tpu.pipeline_mode<synchronous>, transform_indices = @transform_4, window_bounds = array<i64: 1, 192>}, {transform_indices = @transform_5, window_bounds = array<i64: 64, 512>}, {transform_indices = @transform_6, window_bounds = array<i64: 1, 512>}, {transform_indices = @transform_7, window_bounds = array<i64: 1, 512>}, {pipeline_mode = #tpu.pipeline_mode<synchronous>, transform_indices = @transform_8, window_bounds = array<i64: 1, 1>}, {pipeline_mode = #tpu.pipeline_mode<synchronous>, transform_indices = @transform_9, window_bounds = array<i64: 1, 32>}, {pipeline_mode = #tpu.pipeline_mode<synchronous>, transform_indices = @transform_10, window_bounds = array<i64: 1, 32>}, {pipeline_mode = #tpu.pipeline_mode<synchronous>, transform_indices = @transform_11, window_bounds = array<i64: 1, 8>}]} {
    %c0_i32 = arith.constant 0 : i32
    %0 = arith.cmpi eq, %arg0, %c0_i32 : i32
    %1 = arith.extui %0 : i1 to i32
    %c0_i32_0 = arith.constant 0 : i32
    %2 = arith.cmpi ne, %1, %c0_i32_0 : i32
    scf.if %2 {
      %c0_20 = arith.constant 0 : index
      %c0_21 = arith.constant 0 : index
      %28 = vector.load %arg1[%c0_20, %c0_21] : memref<1x96xf32, #tpu.memory_space<vmem>>, vector<1x96xf32>
      %29 = vector.extract_strided_slice %28 {offsets = [0, 64], sizes = [1, 32], strides = [1, 1]} : vector<1x96xf32> to vector<1x32xf32>
      %30 = arith.truncf %28 : vector<1x96xf32> to vector<1x96xbf16>
      %c0_22 = arith.constant 0 : index
      %c0_23 = arith.constant 0 : index
      %31 = vector.load %arg4[%c0_22, %c0_23] : memref<96x192xbf16, #tpu.memory_space<vmem>>, vector<96x192xbf16>
      %cst_24 = arith.constant dense<0.000000e+00> : vector<1x192xf32>
      %32 = tpu.matmul %30, %31, %cst_24 {dimension_numbers = #tpu.dot_dimension_numbers<[1], [0], [0], [1], [0, 0, 1, 1], [], []>} : vector<1x96xbf16>, vector<96x192xbf16>, vector<1x192xf32> -> vector<1x192xf32>
      %c0_25 = arith.constant 0 : index
      %c0_26 = arith.constant 0 : index
      %33 = vector.load %arg5[%c0_25, %c0_26] : memref<1x192xf32, #tpu.memory_space<vmem>>, vector<1x192xf32>
      %34 = arith.addf %32, %33 : vector<1x192xf32>
      %35 = vector.extract_strided_slice %34 {offsets = [0, 0], sizes = [1, 96], strides = [1, 1]} : vector<1x192xf32> to vector<1x96xf32>
      %36 = vector.extract_strided_slice %34 {offsets = [0, 96], sizes = [1, 96], strides = [1, 1]} : vector<1x192xf32> to vector<1x96xf32>
      %37 = vector.extract_strided_slice %35 {offsets = [0, 0], sizes = [1, 32], strides = [1, 1]} : vector<1x96xf32> to vector<1x32xf32>
      %38 = vector.extract_strided_slice %36 {offsets = [0, 0], sizes = [1, 32], strides = [1, 1]} : vector<1x96xf32> to vector<1x32xf32>
      %39 = arith.addf %37, %38 : vector<1x32xf32>
      %40 = arith.negf %39 : vector<1x32xf32>
      %41 = math.exp %40 : vector<1x32xf32>
      %cst_27 = arith.constant 1.000000e+00 : f32
      %42 = vector.broadcast %cst_27 : f32 to vector<1x32xf32>
      %43 = arith.addf %42, %41 : vector<1x32xf32>
      %44 = arith.divf %42, %43 : vector<1x32xf32>
      %45 = vector.extract_strided_slice %35 {offsets = [0, 32], sizes = [1, 32], strides = [1, 1]} : vector<1x96xf32> to vector<1x32xf32>
      %46 = vector.extract_strided_slice %36 {offsets = [0, 32], sizes = [1, 32], strides = [1, 1]} : vector<1x96xf32> to vector<1x32xf32>
      %47 = arith.addf %45, %46 : vector<1x32xf32>
      %48 = arith.negf %47 : vector<1x32xf32>
      %49 = math.exp %48 : vector<1x32xf32>
      %cst_28 = arith.constant 1.000000e+00 : f32
      %50 = vector.broadcast %cst_28 : f32 to vector<1x32xf32>
      %51 = arith.addf %50, %49 : vector<1x32xf32>
      %52 = arith.divf %50, %51 : vector<1x32xf32>
      %53 = vector.extract_strided_slice %35 {offsets = [0, 64], sizes = [1, 32], strides = [1, 1]} : vector<1x96xf32> to vector<1x32xf32>
      %54 = vector.extract_strided_slice %36 {offsets = [0, 64], sizes = [1, 32], strides = [1, 1]} : vector<1x96xf32> to vector<1x32xf32>
      %55 = arith.mulf %44, %54 : vector<1x32xf32>
      %56 = arith.addf %53, %55 : vector<1x32xf32>
      %57 = math.tanh %56 : vector<1x32xf32>
      %cst_29 = arith.constant 1.000000e+00 : f32
      %58 = vector.broadcast %cst_29 : f32 to vector<1x32xf32>
      %59 = arith.subf %58, %52 : vector<1x32xf32>
      %60 = arith.mulf %59, %57 : vector<1x32xf32>
      %61 = arith.mulf %52, %29 : vector<1x32xf32>
      %62 = arith.addf %60, %61 : vector<1x32xf32>
      %c0_30 = arith.constant 0 : index
      %c0_31 = arith.constant 0 : index
      %63 = vector.load %arg2[%c0_30, %c0_31] : memref<8x32xbf16, #tpu.memory_space<vmem>>, vector<8x32xbf16>
      %c0_32 = arith.constant 0 : index
      %c0_33 = arith.constant 0 : index
      %64 = vector.load %arg3[%c0_32, %c0_33] : memref<1x32xbf16, #tpu.memory_space<vmem>>, vector<1x32xbf16>
      %cst_34 = arith.constant dense<0.000000e+00> : vector<1x8xf32>
      %65 = tpu.matmul %64, %63, %cst_34 {dimension_numbers = #tpu.dot_dimension_numbers<[1], [1], [0], [0], [0, 0, 1, 0], [], []>} : vector<1x32xbf16>, vector<8x32xbf16>, vector<1x8xf32> -> vector<1x8xf32>
      %cst_35 = arith.constant dense<0xFF800000> : vector<1xf32>
      %66 = vector.multi_reduction <maximumf>, %65, %cst_35 [1] : vector<1x8xf32> to vector<1xf32>
      %67 = vector.shape_cast %66 : vector<1xf32> to vector<1x1xf32>
      %68 = vector.broadcast %67 : vector<1x1xf32> to vector<1x8xf32>
      %69 = arith.subf %65, %68 : vector<1x8xf32>
      %70 = math.exp %69 : vector<1x8xf32>
      %cst_36 = arith.constant dense<0.000000e+00> : vector<1xf32>
      %71 = vector.multi_reduction <add>, %70, %cst_36 [1] : vector<1x8xf32> to vector<1xf32>
      %72 = vector.shape_cast %71 : vector<1xf32> to vector<1x1xf32>
      %73 = tpu.reciprocal %72 {approx = true} : vector<1x1xf32> -> vector<1x1xf32>
      %74 = vector.broadcast %73 : vector<1x1xf32> to vector<1x8xf32>
      %75 = arith.mulf %70, %74 : vector<1x8xf32>
      %c0_37 = arith.constant 0 : index
      %c0_38 = arith.constant 0 : index
      %76 = vector.load %arg12[%c0_37, %c0_38] : memref<1x8xf32, #tpu.memory_space<vmem>>, vector<1x8xf32>
      tpu.vector_store %arg12[%c0_37, %c0_38], %75 {strides = array<i32>} : memref<1x8xf32, #tpu.memory_space<vmem>>, vector<1x8xf32>,
      %77 = arith.truncf %75 : vector<1x8xf32> to vector<1x8xbf16>
      %cst_39 = arith.constant dense<0.000000e+00> : vector<1x32xf32>
      %78 = tpu.matmul %77, %63, %cst_39 {dimension_numbers = #tpu.dot_dimension_numbers<[1], [0], [0], [1], [0, 0, 1, 1], [], []>} : vector<1x8xbf16>, vector<8x32xbf16>, vector<1x32xf32> -> vector<1x32xf32>
      %c0_40 = arith.constant 0 : index
      %c0_41 = arith.constant 0 : index
      %79 = vector.load %arg10[%c0_40, %c0_41] : memref<1x32xf32, #tpu.memory_space<vmem>>, vector<1x32xf32>
      tpu.vector_store %arg10[%c0_40, %c0_41], %78 {strides = array<i32>} : memref<1x32xf32, #tpu.memory_space<vmem>>, vector<1x32xf32>,
      %c0_42 = arith.constant 0 : index
      %c0_43 = arith.constant 0 : index
      %80 = vector.load %arg11[%c0_42, %c0_43] : memref<1x32xf32, #tpu.memory_space<vmem>>, vector<1x32xf32>
      tpu.vector_store %arg11[%c0_42, %c0_43], %62 {strides = array<i32>} : memref<1x32xf32, #tpu.memory_space<vmem>>, vector<1x32xf32>,
      %81 = tpu.concatenate %62, %78 in 1 : vector<1x32xf32>, vector<1x32xf32> -> vector<1x64xf32>
      %82 = arith.truncf %81 : vector<1x64xf32> to vector<1x64xbf16>
      %c0_44 = arith.constant 0 : index
      %c0_45 = arith.constant 0 : index
      %83 = vector.load %arg13[%c0_44, %c0_45] : memref<1x64xbf16, #tpu.memory_space<vmem>>, vector<1x64xbf16>
      tpu.vector_store %arg13[%c0_44, %c0_45], %82 {strides = array<i32>} : memref<1x64xbf16, #tpu.memory_space<vmem>>, vector<1x64xbf16>,
      %cst_46 = arith.constant 0xFF800000 : f32
      %84 = vector.broadcast %cst_46 : f32 to vector<1x1xf32>
      %c0_47 = arith.constant 0 : index
      %c0_48 = arith.constant 0 : index
      %85 = vector.load %arg14[%c0_47, %c0_48] : memref<1x1xf32, #tpu.memory_space<vmem>>, vector<1x1xf32>
      tpu.vector_store %arg14[%c0_47, %c0_48], %84 {strides = array<i32>} : memref<1x1xf32, #tpu.memory_space<vmem>>, vector<1x1xf32>,
      %cst_49 = arith.constant 0.000000e+00 : f32
      %86 = vector.broadcast %cst_49 : f32 to vector<1x1xf32>
      %c0_50 = arith.constant 0 : index
      %c0_51 = arith.constant 0 : index
      %87 = vector.load %arg15[%c0_50, %c0_51] : memref<1x1xf32, #tpu.memory_space<vmem>>, vector<1x1xf32>
      tpu.vector_store %arg15[%c0_50, %c0_51], %86 {strides = array<i32>} : memref<1x1xf32, #tpu.memory_space<vmem>>, vector<1x1xf32>,
    } else {
    }
    %c0 = arith.constant 0 : index
    %c0_1 = arith.constant 0 : index
    %3 = vector.load %arg13[%c0, %c0_1] : memref<1x64xbf16, #tpu.memory_space<vmem>>, vector<1x64xbf16>
    %c0_2 = arith.constant 0 : index
    %c0_3 = arith.constant 0 : index
    %4 = vector.load %arg6[%c0_2, %c0_3] : memref<64x512xbf16, #tpu.memory_space<vmem>>, vector<64x512xbf16>
    %cst = arith.constant dense<0.000000e+00> : vector<1x512xf32>
    %5 = tpu.matmul %3, %4, %cst {dimension_numbers = #tpu.dot_dimension_numbers<[1], [0], [0], [1], [0, 0, 1, 1], [], []>} : vector<1x64xbf16>, vector<64x512xbf16>, vector<1x512xf32> -> vector<1x512xf32>
    %c0_4 = arith.constant 0 : index
    %c0_5 = arith.constant 0 : index
    %6 = vector.load %arg7[%c0_4, %c0_5] : memref<1x512xf32, #tpu.memory_space<vmem>>, vector<1x512xf32>
    %7 = arith.addf %5, %6 : vector<1x512xf32>
    %c0_6 = arith.constant 0 : index
    %c0_7 = arith.constant 0 : index
    %8 = vector.load %arg8[%c0_6, %c0_7] : memref<1x512xf32, #tpu.memory_space<vmem>>, vector<1x512xf32>
    tpu.vector_store %arg8[%c0_6, %c0_7], %7 {strides = array<i32>} : memref<1x512xf32, #tpu.memory_space<vmem>>, vector<1x512xf32>,
    %c0_8 = arith.constant 0 : index
    %c0_9 = arith.constant 0 : index
    %9 = vector.load %arg14[%c0_8, %c0_9] : memref<1x1xf32, #tpu.memory_space<vmem>>, vector<1x1xf32>
    %cst_10 = arith.constant dense<0xFF800000> : vector<1xf32>
    %10 = vector.multi_reduction <maximumf>, %7, %cst_10 [1] : vector<1x512xf32> to vector<1xf32>
    %11 = vector.shape_cast %10 : vector<1xf32> to vector<1x1xf32>
    %12 = arith.maximumf %9, %11 : vector<1x1xf32>
    %c0_11 = arith.constant 0 : index
    %c0_12 = arith.constant 0 : index
    %13 = vector.load %arg15[%c0_11, %c0_12] : memref<1x1xf32, #tpu.memory_space<vmem>>, vector<1x1xf32>
    %14 = arith.subf %9, %12 : vector<1x1xf32>
    %15 = math.exp %14 : vector<1x1xf32>
    %16 = arith.mulf %13, %15 : vector<1x1xf32>
    %17 = vector.broadcast %12 : vector<1x1xf32> to vector<1x512xf32>
    %18 = arith.subf %7, %17 : vector<1x512xf32>
    %19 = math.exp %18 : vector<1x512xf32>
    %cst_13 = arith.constant dense<0.000000e+00> : vector<1xf32>
    %20 = vector.multi_reduction <add>, %19, %cst_13 [1] : vector<1x512xf32> to vector<1xf32>
    %21 = vector.shape_cast %20 : vector<1xf32> to vector<1x1xf32>
    %22 = arith.addf %16, %21 : vector<1x1xf32>
    %c0_14 = arith.constant 0 : index
    %c0_15 = arith.constant 0 : index
    %23 = vector.load %arg15[%c0_14, %c0_15] : memref<1x1xf32, #tpu.memory_space<vmem>>, vector<1x1xf32>
    tpu.vector_store %arg15[%c0_14, %c0_15], %22 {strides = array<i32>} : memref<1x1xf32, #tpu.memory_space<vmem>>, vector<1x1xf32>,
    %c0_16 = arith.constant 0 : index
    %c0_17 = arith.constant 0 : index
    %24 = vector.load %arg14[%c0_16, %c0_17] : memref<1x1xf32, #tpu.memory_space<vmem>>, vector<1x1xf32>
    tpu.vector_store %arg14[%c0_16, %c0_17], %12 {strides = array<i32>} : memref<1x1xf32, #tpu.memory_space<vmem>>, vector<1x1xf32>,
    %c0_i32_18 = arith.constant 0 : i32
    %25 = arith.cmpi eq, %arg0, %c0_i32_18 : i32
    %26 = arith.extui %25 : i1 to i32
    %c0_i32_19 = arith.constant 0 : i32
    %27 = arith.cmpi ne, %26, %c0_i32_19 : i32
    scf.if %27 {
      %c0_20 = arith.constant 0 : index
      %c0_21 = arith.constant 0 : index
      %28 = vector.load %arg14[%c0_20, %c0_21] : memref<1x1xf32, #tpu.memory_space<vmem>>, vector<1x1xf32>
      %c0_22 = arith.constant 0 : index
      %c0_23 = arith.constant 0 : index
      %29 = vector.load %arg15[%c0_22, %c0_23] : memref<1x1xf32, #tpu.memory_space<vmem>>, vector<1x1xf32>
      %30 = math.log %29 : vector<1x1xf32>
      %31 = arith.addf %28, %30 : vector<1x1xf32>
      %c0_24 = arith.constant 0 : index
      %c0_25 = arith.constant 0 : index
      %32 = vector.load %arg9[%c0_24, %c0_25] : memref<1x1xf32, #tpu.memory_space<vmem>>, vector<1x1xf32>
      tpu.vector_store %arg9[%c0_24, %c0_25], %31 {strides = array<i32>} : memref<1x1xf32, #tpu.memory_space<vmem>>, vector<1x1xf32>,
    } else {
    }
    return
  }
  func.func @transform_0(%arg0: i32) -> (i32, i32) {
    %c0_i32 = arith.constant 0 : i32
    %c0_i32_0 = arith.constant 0 : i32
    %c0_i32_1 = arith.constant 0 : i32
    return %c0_i32, %c0_i32_0 : i32, i32
  }
  func.func @transform_1(%arg0: i32) -> (i32, i32) {
    %c0_i32 = arith.constant 0 : i32
    %c0_i32_0 = arith.constant 0 : i32
    %c0_i32_1 = arith.constant 0 : i32
    return %c0_i32, %c0_i32_0 : i32, i32
  }
  func.func @transform_2(%arg0: i32) -> (i32, i32) {
    %c0_i32 = arith.constant 0 : i32
    %c0_i32_0 = arith.constant 0 : i32
    %c0_i32_1 = arith.constant 0 : i32
    return %c0_i32, %c0_i32_0 : i32, i32
  }
  func.func @transform_3(%arg0: i32) -> (i32, i32) {
    %c0_i32 = arith.constant 0 : i32
    %c0_i32_0 = arith.constant 0 : i32
    %c0_i32_1 = arith.constant 0 : i32
    return %c0_i32, %c0_i32_0 : i32, i32
  }
  func.func @transform_4(%arg0: i32) -> (i32, i32) {
    %c0_i32 = arith.constant 0 : i32
    %c0_i32_0 = arith.constant 0 : i32
    %c0_i32_1 = arith.constant 0 : i32
    return %c0_i32, %c0_i32_0 : i32, i32
  }
  func.func @transform_5(%arg0: i32) -> (i32, i32) {
    %c0_i32 = arith.constant 0 : i32
    %c0_i32_0 = arith.constant 0 : i32
    return %c0_i32, %arg0 : i32, i32
  }
  func.func @transform_6(%arg0: i32) -> (i32, i32) {
    %c0_i32 = arith.constant 0 : i32
    %c0_i32_0 = arith.constant 0 : i32
    return %c0_i32, %arg0 : i32, i32
  }
  func.func @transform_7(%arg0: i32) -> (i32, i32) {
    %c0_i32 = arith.constant 0 : i32
    %c0_i32_0 = arith.constant 0 : i32
    return %c0_i32, %arg0 : i32, i32
  }
  func.func @transform_8(%arg0: i32) -> (i32, i32) {
    %c0_i32 = arith.constant 0 : i32
    %c0_i32_0 = arith.constant 0 : i32
    %c0_i32_1 = arith.constant 0 : i32
    return %c0_i32, %c0_i32_0 : i32, i32
  }
  func.func @transform_9(%arg0: i32) -> (i32, i32) {
    %c0_i32 = arith.constant 0 : i32
    %c0_i32_0 = arith.constant 0 : i32
    %c0_i32_1 = arith.constant 0 : i32
    return %c0_i32, %c0_i32_0 : i32, i32
  }
  func.func @transform_10(%arg0: i32) -> (i32, i32) {
    %c0_i32 = arith.constant 0 : i32
    %c0_i32_0 = arith.constant 0 : i32
    %c0_i32_1 = arith.constant 0 : i32
    return %c0_i32, %c0_i32_0 : i32, i32
  }
  func.func @transform_11(%arg0: i32) -> (i32, i32) {
    %c0_i32 = arith.constant 0 : i32
    %c0_i32_0 = arith.constant 0 : i32
    %c0_i32_1 = arith.constant 0 : i32
    return %c0_i32, %c0_i32_0 : i32, i32
  }
}

</mosaic_0001>

<bundles_post_ra>
// kernel: tpu_custom_call.1
= control target key start
LH: loop header
LB: loop body
LE: loop exit
PB: predicated region body
PF: predicated region fallthrough
CT: control target
= control target key end

     0   :  { %17 = vsyncpa [#allocation6], 0  ;;  %s1289_s0 = inlined_call_operand.hbm [shape: f32[1,96], index: 0, kind: input, shape index: {}]   ;;  %s1290_s1 = inlined_call_operand.hbm [shape: bf16[8,32], index: 1, kind: input, shape index: {}]   ;;  %s1291_s2 = inlined_call_operand.vmem [shape: bf16[1,32], index: 2, kind: input, shape index: {}]   ;;  %s1292_s3 = inlined_call_operand.hbm [shape: bf16[96,192], index: 3, kind: input, shape index: {}]   ;;  %s1293_s4 = inlined_call_operand.vmem [shape: f32[1,192], index: 4, kind: input, shape index: {}]   ;;  %s1294_s5 = inlined_call_operand.hbm [shape: bf16[64,512], index: 5, kind: input, shape index: {}]   ;;  %s1295_s6 = inlined_call_operand.vmem [shape: f32[1,512], index: 6, kind: input, shape index: {}]   ;;  %s1296_s7 = inlined_call_operand.hbm [shape: f32[1,512], index: 7, kind: output, shape index: {0}]   ;;  %s1297_s8 = inlined_call_operand.hbm [shape: f32[1,1], index: 8, kind: output, shape index: {1}]   ;;  %s1298_s9 = inlined_call_operand.hbm [shape: f32[1,32], index: 9, kind: output, shape index: {2}]   ;;  %s1299_s10 = inlined_call_operand.hbm [shape: f32[1,32], index: 10, kind: output, shape index: {3}]   ;;  %s1300_s11 = inlined_call_operand.hbm [shape: f32[1,8], index: 11, kind: output, shape index: {4}]  }
   0x1   :  { %18 = vsyncpa [#allocation9], 0 }
   0x2   :  { %19 = vsyncpa [#allocation12], 0 }
   0x3   :  { %20 = vsyncpa [#allocation7], 0 }
   0x4   :  { %21 = vsyncpa [#allocation15], 0 }
   0x5   :  { %22 = vsyncpa [#allocation18], 0  ;;  %s1104_s17 = smov [#allocation8]   ;;  %s1105_s19 = smov [#allocation5]  }
   0x6   :  { %s39_s18 = sshll.u32 %s1104_s17, 4  ;;  %s29_s20 = sshll.u32 %s1105_s19, 4  ;;  %s40_s18 = int_to_ptr.vmem [resolvable:$true] %s39_s18  ;;  %s30_s20 = int_to_ptr.vmem [resolvable:$true] %s29_s20 }
   0x7   :  { %s920_s21 = scalar_lea.vmem %s40_s18, 64  ;;  %p925_p1 = scmp.lt.s32.totalorder %s40_s18, %s40_s18 }
   0x8   :  { %p921_p0 = scmp.ne.s32.totalorder %s40_s18, %s920_s21  ;;  %p926_p2 = scmp.lt.s32.totalorder %s920_s21, %s920_s21 }
   0xa   :  { %p927_p3 = por %p926_p2, %p925_p1 }
   0xc   :  { %p928_p4 = pnand %p927_p3, %p921_p0 }
   0xe   :  { %931 = shalt.err (!%p928_p4)
}
   0xf   :  { %42 = dma.hbm_to_vmem [thread:$0]  %s1290_s1, 64, %s40_s18, [#allocation9]  }
  0x10   :  { %s940_s24 = scalar_lea.vmem %s30_s20, 16  ;;  %s944_s25 = scalar_lea.vmem %s30_s20, 32 }
  0x11   :  { %p941_p5 = scmp.ne.s32.totalorder %s30_s20, %s940_s24  ;;  %p945_p6 = scmp.lt.s32.totalorder %s30_s20, %s30_s20 }
  0x12   :  { %p946_p7 = scmp.lt.s32.totalorder %s944_s25, %s940_s24 }
  0x14   :  { %p947_p8 = por %p946_p7, %p945_p6 }
  0x16   :  { %p948_p9 = pnand %p947_p8, %p941_p5 }
  0x18   :  { %951 = shalt.err (!%p948_p9)
}
  0x19   :  { %32 = dma.hbm_to_vmem [thread:$0]  %s1289_s0, 16, %s30_s20, [#allocation6]  }
  0x1a   :  { %s1106_s28 = smov [#allocation10]  }
  0x1b   :  { %s50_s29 = sshll.u32 %s1106_s28, 4  ;;  %s51_s29 = int_to_ptr.vmem [resolvable:$true] %s50_s29 }
  0x1c   :  { %s960_s30 = scalar_lea.vmem %s51_s29, 1536  ;;  %p965_p11 = scmp.lt.s32.totalorder %s51_s29, %s51_s29 }
  0x1d   :  { %p961_p10 = scmp.ne.s32.totalorder %s51_s29, %s960_s30  ;;  %p966_p12 = scmp.lt.s32.totalorder %s960_s30, %s960_s30 }
  0x1f   :  { %p967_p13 = por %p966_p12, %p965_p11 }
  0x21   :  { %p968_p0 = pnand %p967_p13, %p961_p10 }
  0x23   :  { %971 = shalt.err (!%p968_p0)
}
  0x24   :  { %s1107_s1 = smov 128   ;;  %s1108_s12 = smov 8  }
  0x25   :  { %56 = dma.hbm_to_vmem [thread:$0]  %s1292_s3, 1536, %s51_s29, [#allocation9], %s1107_s1, %s1107_s1, %s1108_s12  }
  0x26   :  { %s1109_s15 = smov [#allocation11]  }
  0x27   :  { %s64_s16 = sshll.u32 %s1109_s15, 4  ;;  %s65_s16 = int_to_ptr.vmem [resolvable:$true] %s64_s16 }
  0x28   :  { %s980_s0 = scalar_lea.vmem %s65_s16, 2048  ;;  %p985_p2 = scmp.lt.s32.totalorder %s65_s16, %s65_s16 }
  0x29   :  { %p981_p1 = scmp.ne.s32.totalorder %s65_s16, %s980_s0  ;;  %p986_p3 = scmp.lt.s32.totalorder %s980_s0, %s980_s0 }
  0x2b   :  { %p987_p4 = por %p986_p3, %p985_p2 }
  0x2d   :  { %p988_p5 = pnand %p987_p4, %p981_p1 }
  0x2f   :  { %991 = shalt.err (!%p988_p5)
}
  0x30   :  { %s1110_s17 = smov 256   ;;  %s1111_s18 = smov 16  }
  0x31   :  { %70 = dma.hbm_to_vmem [thread:$0]  %s1294_s5, 2048, %s65_s16, [#allocation12], %s1110_s17, %s1110_s17, %s1111_s18  }
  0x32   :  { %1092 = dma.done.wait [#allocation6], 16  }
  0x33   :  { %1093 = vsyncadd [#allocation6], 4294967280 }
  0x34   :  { %1094 = dma.done.wait [#allocation9], 1600  }
  0x35   :  { %1095 = vsyncadd [#allocation9], 4294965696 }
  0x36   :  { %1096 = dma.done.wait [#allocation12], 2048  }
  0x37   :  { %1097 = vsyncadd [#allocation12], 4294965248  ;;  %vm398_vm0 = vcmask 0   ;;  %v1112_v0 = vmov 0.0   ;;  %vm1113_vm1 = vmmov 0   ;;  %v1114_v1 = vmov 0  }
  0x38   :  { %810 = vmatprep.subr.bf16.mxu1 %v1112_v0  ;;  %400 = vst.msk [vmem:[#allocation4] sm:$0x1] %vm398_vm0, %v1112_v0  ;;  %812 = vmatprep.mubr.msk.bf16.mxu1 %vm1113_vm1, %v1112_v0  ;;  %vm271_vm2 = vcmask 261120   ;;  %v269_v2 = vld [vmem:[#allocation8] sm:$0xf]  ;;  %vm336_vm3 = vcmask 1043456   ;;  %v166_v23 = vlaneseq }
  0x39   :  { %212 = vmatprep.mubr.bf16.mxu0 %v1114_v1  ;;  %843 = vset.pattern.permute.xlu0 %v1114_v1  ;;  %v276_v3 = vsel %vm271_vm2, %v269_v2, 0  ;;  %v844_v4 = vld [vmem:[#allocation10 + $0x54] ss:$8 sps:$4 sm:$0xff]   ;;  %v846_v5 = vld [vmem:[#allocation10 + $0x50] ss:$8 sps:$4 sm:$0xff]   ;;  %v337_v10 = vsel %vm336_vm3, %v269_v2, 0 }
  0x3a   :  { %811 = vmatpush3.bf16.xpose.msra.mxu1 %v276_v3  ;;  %v847_v6 = vld [vmem:[#allocation10 + $0x44] ss:$8 sps:$4 sm:$0xff]   ;;  %184 = vmatprep.subr.bf16.mxu0 %v844_v4  ;;  %v849_v7 = vld [vmem:[#allocation10 + $0x40] ss:$8 sps:$4 sm:$0xff]   ;;  %v850_v8 = vld [vmem:[#allocation10 + $0x34] ss:$8 sps:$4 sm:$0xff]  }
  0x3b   :  { %816 = vmatprep.subr.bf16.mxu1 %v1112_v0  ;;  %185 = vmatpush1.bf16.msra.mxu0 %v846_v5  ;;  %v270_v9 = vld [vmem:[%s1291_s2] sm:$0x1]  ;;  %v852_v11 = vld [vmem:[#allocation10 + $0x30] ss:$8 sps:$4 sm:$0xff]   ;;  %v855_v13 = vld [vmem:[#allocation10 + $0x20] ss:$8 sps:$4 sm:$0xff]  }
  0x3c   :  { %186 = vmatprep.subr.bf16.mxu0 %v847_v6  ;;  %v853_v12 = vld [vmem:[#allocation10 + $0x24] ss:$8 sps:$4 sm:$0xff]   ;;  %v856_v14 = vld [vmem:[#allocation10 + $0x14] ss:$8 sps:$4 sm:$0xff]   ;;  %v858_v15 = vld [vmem:[#allocation10 + $0x10] ss:$8 sps:$4 sm:$0xff]  }
  0x3d   :  { %v859_v16 = vld [vmem:[#allocation10 + $0x4] ss:$8 sps:$4 sm:$0xff]   ;;  %v861_v17 = vld [vmem:[#allocation10] ss:$8 sps:$4 sm:$0xff]   ;;  %v1207_v18 = vld [vmem:[#allocation5] sm:$0x1] }
  0x3e   :  { %v91_v19 = vpack.c.bf16 %v1207_v18, %v1207_v18  ;;  %vm176_vm4 = vcmask 785408   ;;  %vm318_vm5 = vcmask 57344   ;;  %v1214_v26 = vshrl.u32 %v166_v23, 7  ;;  %v104_v28 = vld [vmem:[%s1293_s4] sm:$0x3]  ;;  %s1115_s22 = smov 32  }
  0x3f   :  { %187 = vmatpush1.bf16.msra.mxu0 %v849_v7  ;;  %s1116_s23 = smov 96   ;;  %s1117_s4 = smov 64   ;;  %vm332_vm6 = vcmask 64512   ;;  %v864_v2 = vld [vmem:[#allocation11 + $0x64] ss:$16 sps:$4 sm:$0xff]   ;;  %vm379_vm7 = vcmask 253952  }
  0x40   :  { %188 = vmatprep.subr.bf16.mxu0 %v850_v8  ;;  %v1217_v27 = vsub.s32 0, %v1214_v26  ;;  %v172_v29 = vsub.s32 1, %v1214_v26  ;;  %v865_v3 = vld [vmem:[#allocation11 + $0x68] ss:$16 sps:$4 sm:$0xff]   ;;  %v867_v4 = vld [vmem:[#allocation11 + $0x6c] ss:$16 sps:$4 sm:$0xff]  }
  0x41   :  { %813 = vmatmul.mubr.msk.bf16.vlgmr.msra.gmra.mxu1 %vm271_vm2, %v270_v9  ;;  %vm392_vm8 = vcmask 516096   ;;  %vm393_vm9 = vsmask.f32 256  ;;  %vm520_vm11 = vcmask 523264   ;;  %vm641_vm12 = vcmask 1040384  }
  0x42   :  { %817 = vmatpush3.bf16.msra.mxu1 %v337_v10  ;;  %818 = vmatprep.mubr.msk.bf16.mxu1 %vm1113_vm1, %v1112_v0  ;;  %v169_v30 = vrot.slane %v104_v28, %v1217_v27  ;;  %v173_v31 = vrot.slane %v104_v28, %v172_v29  ;;  %v263_v58 = vrot.slane %v1207_v18, %v1217_v27  ;;  %v862_v0 = vld [vmem:[#allocation11 + $0x60] ss:$16 sps:$4 sm:$0xff]   ;;  %v877_v18 = vld [vmem:[#allocation11 + $0x28] ss:$16 sps:$4 sm:$0xff]   ;;  %vm394_vm10 = vmand %vm392_vm8, %vm393_vm9  ;;  %vm637_vm13 = vcmp.lt.s32.totalorder %v166_v23, 512 }
  0x43   :  { %189 = vmatpush1.bf16.msra.mxu0 %v852_v11  ;;  %532 = vmatprep.subr.bf16.mxu1 %v864_v2  ;;  %v870_v11 = vld [vmem:[#allocation11 + $0x44] ss:$16 sps:$4 sm:$0xff]  }
  0x44   :  { %190 = vmatprep.subr.bf16.mxu0 %v853_v12  ;;  %v873_v12 = vld [vmem:[#allocation11 + $0x4c] ss:$16 sps:$4 sm:$0xff]  }
  0x47   :  { %191 = vmatpush1.bf16.msra.mxu0 %v855_v13  ;;  %v868_v13 = vld [vmem:[#allocation11 + $0x40] ss:$16 sps:$4 sm:$0xff]  }
  0x48   :  { %192 = vmatprep.subr.bf16.mxu0 %v856_v14  ;;  %v871_v14 = vld [vmem:[#allocation11 + $0x48] ss:$16 sps:$4 sm:$0xff]  }
  0x4b   :  { %193 = vmatpush1.bf16.msra.mxu0 %v858_v15  ;;  %v876_v15 = vld [vmem:[#allocation11 + $0x24] ss:$16 sps:$4 sm:$0xff]  }
  0x4c   :  { %194 = vmatprep.subr.bf16.mxu0 %v859_v16  ;;  %v879_v16 = vld [vmem:[#allocation11 + $0x2c] ss:$16 sps:$4 sm:$0xff]  }
  0x4f   :  { %195 = vmatpush1.bf16.msra.mxu0 %v861_v17  ;;  %v874_v17 = vld [vmem:[#allocation11 + $0x20] ss:$16 sps:$4 sm:$0xff]  }
  0x50   :  { %573 = vmatprep.subr.bf16.mxu0 %v867_v4 }
  0x52   :  { %783 = vmatmul.mubr.msk.bf16.vlgmr.msra.gmra.mxu0 %vm176_vm4, %v91_v19  ;;  %v882_v19 = vld [vmem:[#allocation11 + $0x4] ss:$16 sps:$4 sm:$0xff]  }
  0x53   :  { %597 = vmatprep.mubr.bf16.mxu0 %v1114_v1  ;;  %574 = vmatpush1.bf16.msra.mxu0 %v865_v3 }
  0x54   :  { %575 = vmatprep.subr.bf16.mxu0 %v873_v12 }
  0x57   :  { %576 = vmatpush1.bf16.msra.mxu0 %v871_v14 }
  0x58   :  { %577 = vmatprep.subr.bf16.mxu0 %v879_v16 }
  0x5b   :  { %578 = vmatpush1.bf16.msra.mxu0 %v877_v18 }
 0x101   :  { %v312_v20 = vpop.f32.mrf.mxu1 }
 0x102   :  { %v319_v21 = vsel %vm318_vm5, %v312_v20, -inf }
 0x103   :  { %320 = vmax.xlane.f32.xlu0 %v319_v21  ;;  %v814_v22 = vpop.f32.mrf.mxu1  ;;  %v880_v21 = vld [vmem:[#allocation11] ss:$16 sps:$4 sm:$0xff]  }
 0x104   :  { %v883_v22 = vld [vmem:[#allocation11 + $0x8] ss:$16 sps:$4 sm:$0xff]  }
 0x105   :  { %v315_v24 = vpop.f32.mrf.mxu1 }
 0x107   :  { %v815_v25 = vpop.f32.mrf.mxu1 }
 0x112   :  { %v214_v32 = vpop.f32.mrf.mxu0 }
 0x113   :  { %v215_v33 = vadd.f32 %v214_v32, %v169_v30 }
 0x114   :  { %v216_v34 = vpop.f32.mrf.mxu0 }
 0x115   :  { %222 = vrot.lane.b32.xlu1 %v215_v33, %s1115_s22  ;;  %v217_v35 = vadd.f32 %v216_v34, %v173_v31 }
 0x116   :  { %v218_v36 = vpop.f32.mrf.mxu0 }
 0x118   :  { %v219_v37 = vpop.f32.mrf.mxu0 }
 0x119   :  { %243 = vrot.lane.b32.xlu1 %v217_v35, %s1116_s23 }
 0x11d   :  { %233 = vrot.lane.b32.xlu1 %v217_v35, %s1115_s22 }
 0x187   :  { %v223_v38 = vpop.permute.xlu1 %222 }
 0x188   :  { %v225_v39 = vadd.f32 %v223_v38, %v215_v33  ;;  %v1118_v38 = vmov -inf  }
 0x189   :  { %399 = vst.msk [vmem:[#allocation3] sm:$0x1] %vm398_vm0, %v1118_v38 }
 0x18a   :  { %v784_v40 = vmul.f32 -1.442695, %v225_v39  ;;  %v510_v39 = vsub.s32 2, %v1214_v26 }
 0x18b   :  { %v244_v49 = vpop.permute.xlu1 %243 }
 0x18c   :  { %v321_v41 = vpop.xlane.xlu0 %320  ;;  %886 = vpow2.f32 %v784_v40  ;;  %v418_v40 = vld [vmem:[%s1295_s6] sm:$0xf]  ;;  %s1120_s6 = smov [#allocation17]  }
 0x18d   :  { %v322_v42 = vsub.f32 %v312_v20, %v321_v41  ;;  %v885_v20 = vld [vmem:[#allocation11 + $0xc] ss:$16 sps:$4 sm:$0xff]   ;;  %v1119_v41 = vmov 1966171168   ;;  %s736_s26 = sshll.u32 %s1120_s6, 4  ;;  %s737_s26 = int_to_ptr.vmem [resolvable:$true] %s736_s26 }
 0x18e   :  { %579 = vmatprep.subr.bf16.mxu0 %v885_v20  ;;  %s992_s27 = scalar_lea.vmem %s737_s26, 16  ;;  %s996_s28 = scalar_lea.vmem %s737_s26, 32 }
 0x18f   :  { %v323_v43 = vmul.f32 1.442695, %v322_v42  ;;  %v234_v59 = vpop.permute.xlu1 %233  ;;  %580 = vmatpush1.bf16.msra.mxu0 %v883_v22  ;;  %v613_v42 = vunpack.c.l.s4 %v1119_v41  ;;  %p993_p6 = scmp.ne.s32.totalorder %s737_s26, %s992_s27  ;;  %p997_p7 = scmp.lt.s32.totalorder %s737_s26, %s737_s26 }
 0x190   :  { %v236_v60 = vadd.f32 %v234_v59, %v215_v33  ;;  %p998_p8 = scmp.lt.s32.totalorder %s996_s28, %s992_s27 }
 0x191   :  { %888 = vpow2.f32 %v323_v43  ;;  %v514_v43 = vsub.s32 3, %v1214_v26 }
 0x192   :  { %v785_v61 = vmul.f32 -1.442695, %v236_v60  ;;  %p999_p9 = por %p998_p8, %p997_p7 }
 0x194   :  { %p1000_p10 = pnand %p999_p9, %p993_p6 }
 0x199   :  { %v887_v44 = vpop.eup %886 }
 0x19a   :  { %v229_v47 = vadd.f32 1.0, %v887_v44  ;;  %v503_v44 = vrot.slane %v418_v40, %v1217_v27 }
 0x19c   :  { %890 = vrcp.f32 %v229_v47  ;;  %v614_v47 = vunpack.c.0.s8 %v613_v42 }
 0x19e   :  { %v889_v45 = vpop.eup %888 }
 0x19f   :  { %v325_v46 = vsel %vm318_vm5, %v889_v45, 0.0 }
 0x1a0   :  { %326 = vadd.xlane.f32.xlu0 %v325_v46  ;;  %v507_v46 = vrot.slane %v418_v40, %v172_v29 }
 0x1a9   :  { %v891_v48 = vpop.eup %890 }
 0x1aa   :  { %v246_v50 = vmul.f32 %v891_v48, %v244_v49  ;;  %v515_v48 = vrot.slane %v418_v40, %v514_v43 }
 0x1b6   :  { %248 = vrot.lane.b32.xlu0 %v246_v50, %s1117_s4 }
 0x229   :  { %v327_v51 = vpop.xlane.xlu0 %326 }
 0x22a   :  { %892 = vrcp.f32 %v327_v51 }
 0x22d   :  { %v249_v52 = vpop.permute.xlu0 %248 }
 0x22e   :  { %v251_v53 = vadd.f32 %v249_v52, %v215_v33  ;;  %v395_v33 = vld [vmem:[#allocation2] sm:$0x1] }
 0x230   :  { %894 = vtanh.f32 %v251_v53 }
 0x231   :  { %896 = vpow2.f32 %v785_v61 }
 0x237   :  { %v893_v54 = vpop.eup %892 }
 0x238   :  { %v329_v55 = vmul.f32 %v893_v54, %v889_v45  ;;  %v511_v45 = vrot.slane %v418_v40, %v510_v39 }
 0x23a   :  { %v331_v56 = vpack.c.bf16 %v329_v55, %v329_v55  ;;  %330 = vst.msk [vmem:[#allocation19] sm:$0x1] %vm318_vm5, %v329_v55 }
 0x23c   :  { %819 = vmatmul.mubr.msk.bf16.vlgmr.msra.gmra.mxu1 %vm332_vm6, %v331_v56  ;;  %v617_v56 = vsub.s32 %v614_v47, %v1214_v26 }
 0x23d   :  { %v895_v57 = vpop.eup %894  ;;  %556 = vmatprep.mubr.bf16.mxu1 %v1114_v1  ;;  %533 = vmatpush1.bf16.msra.mxu1 %v862_v0 }
 0x23e   :  { %255 = vrot.lane.b32.xlu1 %v895_v57, %s1116_s23  ;;  %v897_v62 = vpop.eup %896  ;;  %534 = vmatprep.subr.bf16.mxu1 %v870_v11 }
 0x23f   :  { %v240_v63 = vadd.f32 1.0, %v897_v62 }
 0x241   :  { %898 = vrcp.f32 %v240_v63  ;;  %535 = vmatpush1.bf16.msra.mxu1 %v868_v13 }
 0x242   :  { %264 = vrot.lane.b32.xlu1 %v263_v58, %s1116_s23  ;;  %536 = vmatprep.subr.bf16.mxu1 %v876_v15 }
 0x245   :  { %537 = vmatpush1.bf16.msra.mxu1 %v874_v17 }
 0x246   :  { %538 = vmatprep.subr.bf16.mxu1 %v882_v19 }
 0x249   :  { %539 = vmatpush1.bf16.msra.mxu1 %v880_v21 }
 0x24e   :  { %v899_v1 = vpop.eup %898 }
 0x24f   :  { %v253_v6 = vsub.f32 1.0, %v899_v1 }
 0x2b0   :  { %v256_v5 = vpop.permute.xlu1 %255 }
 0x2b1   :  { %v258_v8 = vmul.f32 %v256_v5, %v253_v6 }
 0x2b4   :  { %v265_v7 = vpop.permute.xlu1 %264 }
 0x2b5   :  { %v267_v9 = vmul.f32 %v899_v1, %v265_v7 }
 0x2b7   :  { %v268_v10 = vadd.f32 %v267_v9, %v258_v8  ;;  %v1254_v9 = vld [vmem:[#allocation3] sm:$0x1] }
 0x2b9   :  { %382 = vrot.lane.b32.xlu1 %v268_v10, %s1116_s23 }
 0x2fc   :  { %v373_v24 = vpop.f32.mrf.mxu1 }
 0x2fd   :  { %380 = vst.msk [vmem:[#allocation16] sm:$0x1] %vm379_vm7, %v373_v24  ;;  %387 = vrot.lane.b32.xlu1 %v373_v24, %s1115_s22 }
 0x2fe   :  { %v820_v25 = vpop.f32.mrf.mxu1 }
 0x300   :  { %v376_v28 = vpop.f32.mrf.mxu1 }
 0x302   :  { %v821_v30 = vpop.f32.mrf.mxu1 }
 0x32b   :  { %v383_v31 = vpop.permute.xlu1 %382 }
 0x32c   :  { %385 = vst.msk [vmem:[#allocation17] sm:$0x1] %vm379_vm7, %v383_v31 }
 0x36f   :  { %v388_v32 = vpop.permute.xlu1 %387 }
 0x370   :  { %v390_v34 = vsel %vm271_vm2, %v383_v31, %v388_v32 }
 0x371   :  { %v391_v35 = vpack.c.bf16 %v390_v34, %v390_v34 }
 0x373   :  { %v396_v36 = vsel %vm394_vm10, %v391_v35, %v395_v33 }
 0x374   :  { %397 = vst [vmem:[#allocation2] sm:$0x1] %v396_v36 }
 0x37b   :  { %v401_v37 = vld [vmem:[#allocation2] sm:$0x1] }
 0x37c   :  { %804 = vmatmul.mubr.msk.bf16.vlgmr.msra.gmra.mxu1 %vm520_vm11, %v401_v37  ;;  %805 = vmatmul.mubr.msk.bf16.vlgmr.msra.gmra.mxu0 %vm520_vm11, %v401_v37 }
 0x43c   :  { %v558_v49 = vpop.f32.mrf.mxu1  ;;  %v599_v50 = vpop.f32.mrf.mxu0 }
 0x43d   :  { %v559_v51 = vadd.f32 %v558_v49, %v503_v44  ;;  %v600_v52 = vadd.f32 %v599_v50, %v511_v45 }
 0x43e   :  { %v560_v53 = vpop.f32.mrf.mxu1  ;;  %v601_v54 = vpop.f32.mrf.mxu0 }
 0x43f   :  { %v561_v55 = vadd.f32 %v560_v53, %v507_v46  ;;  %v602_v57 = vadd.f32 %v601_v54, %v515_v48  ;;  %v642_v60 = vsel %vm641_vm12, %v559_v51, -inf  ;;  %v644_v61 = vsel %vm641_vm12, %v600_v52, -inf }
 0x440   :  { %v562_v58 = vpop.f32.mrf.mxu1  ;;  %v603_v59 = vpop.f32.mrf.mxu0 }
 0x441   :  { %v610_v29 = vcombine.low %v559_v51, %v561_v55  ;;  %v611_v62 = vcombine.low %v600_v52, %v602_v57  ;;  %v643_v63 = vsel %vm641_vm12, %v561_v55, -inf  ;;  %v645_v0 = vsel %vm641_vm12, %v602_v57, -inf }
 0x442   :  { %v563_v2 = vpop.f32.mrf.mxu1  ;;  %v604_v3 = vpop.f32.mrf.mxu0  ;;  %v646_v4 = vmax.f32 %v642_v60, %v643_v63  ;;  %v647_v1 = vmax.f32 %v644_v61, %v645_v0 }
 0x443   :  { %v618_v5 = vrot.slane %v610_v29, %v617_v56  ;;  %v625_v6 = vrot.slane %v611_v62, %v617_v56 }
 0x444   :  { %v648_v26 = vmax.f32 %v646_v4, %v647_v1 }
 0x445   :  { %v626_v7 = vcombine.low %v618_v5, %v625_v6 }
 0x446   :  { %649 = vmax.xlane.f32.xlu1 %v648_v26 }
 0x447   :  { %v633_v8 = vrot.slane %v626_v7, %v617_v56 }
 0x449   :  { %639 = vst.msk [vmem:[#allocation13] sm:$0xf] %vm637_vm13, %v633_v8 }
 0x4cf   :  { %v650_v10 = vpop.xlane.xlu1 %649 }
 0x4d0   :  { %v1257_v11 = vmax.f32 %v1254_v9, %v650_v10 }
 0x4d2   :  { %v653_v12 = vsub.f32 %v1254_v9, %v1257_v11  ;;  %690 = vst.msk [vmem:[#allocation3] sm:$0x1] %vm398_vm0, %v1257_v11  ;;  %659 = vperm.xlu0 %843, %v1257_v11  }
 0x54d   :  { %v660_v13 = vpop.permute.xlu0 %659 }
 0x54e   :  { %v665_v14 = vrot.slane %v660_v13, %v1217_v27 }
 0x550   :  { %v666_v23 = vsub.f32 %v559_v51, %v665_v14  ;;  %v667_v15 = vsub.f32 %v561_v55, %v665_v14  ;;  %v668_v16 = vsub.f32 %v600_v52, %v665_v14  ;;  %v669_v17 = vsub.f32 %v602_v57, %v665_v14 }
 0x552   :  { %v670_v18 = vmul.f32 1.442695, %v666_v23  ;;  %v672_v19 = vmul.f32 1.442695, %v667_v15  ;;  %v674_v20 = vmul.f32 1.442695, %v668_v16 }
 0x553   :  { %v676_v21 = vmul.f32 1.442695, %v669_v17 }
 0x554   :  { %900 = vpow2.f32 %v670_v18 }
 0x555   :  { %902 = vpow2.f32 %v672_v19 }
 0x556   :  { %904 = vpow2.f32 %v674_v20 }
 0x557   :  { %906 = vpow2.f32 %v676_v21 }
 0x561   :  { %v901_v22 = vpop.eup %900 }
 0x562   :  { %v903_v24 = vpop.eup %902  ;;  %v678_v25 = vsel %vm641_vm12, %v901_v22, 0.0 }
 0x563   :  { %v905_v28 = vpop.eup %904  ;;  %v679_v30 = vsel %vm641_vm12, %v903_v24, 0.0 }
 0x564   :  { %v907_v27 = vpop.eup %906  ;;  %v680_v31 = vadd.f32 %v679_v30, %v678_v25  ;;  %v681_v32 = vsel %vm641_vm12, %v905_v28, 0.0 }
 0x565   :  { %v683_v34 = vsel %vm641_vm12, %v907_v27, 0.0 }
 0x566   :  { %v682_v33 = vadd.f32 %v681_v32, %v680_v31 }
 0x568   :  { %v684_v35 = vadd.f32 %v683_v34, %v682_v33 }
 0x56a   :  { %685 = vadd.xlane.f32.xlu0 %v684_v35 }
 0x56b   :  { %1003 = shalt.err (!%p1000_p10)
}
 0x56c   :  { %739 = dma.vmem_to_hbm [thread:$0]  %s737_s26, 16, %s1299_s10, [#allocation18]  }
 0x56d   :  { %s1121_s1 = smov [#allocation13]  }
 0x56e   :  { %s706_s12 = sshll.u32 %s1121_s1, 4  ;;  %s707_s12 = int_to_ptr.vmem [resolvable:$true] %s706_s12 }
 0x56f   :  { %s1012_s13 = scalar_lea.vmem %s707_s12, 64  ;;  %p1017_p12 = scmp.lt.s32.totalorder %s707_s12, %s707_s12 }
 0x570   :  { %p1013_p11 = scmp.ne.s32.totalorder %s707_s12, %s1012_s13  ;;  %p1018_p13 = scmp.lt.s32.totalorder %s1012_s13, %s1012_s13 }
 0x572   :  { %p1019_p0 = por %p1018_p13, %p1017_p12 }
 0x574   :  { %p1020_p1 = pnand %p1019_p0, %p1013_p11 }
 0x576   :  { %1023 = shalt.err (!%p1020_p1)
}
 0x577   :  { %709 = dma.vmem_to_hbm [thread:$0]  %s707_s12, 64, %s1296_s7, [#allocation7]  }
 0x578   :  { %s1122_s16 = smov [#allocation19]  }
 0x579   :  { %s746_s0 = sshll.u32 %s1122_s16, 4  ;;  %s747_s0 = int_to_ptr.vmem [resolvable:$true] %s746_s0 }
 0x57a   :  { %s1032_s17 = scalar_lea.vmem %s747_s0, 16  ;;  %s1036_s10 = scalar_lea.vmem %s747_s0, 32 }
 0x57b   :  { %p1033_p2 = scmp.ne.s32.totalorder %s747_s0, %s1032_s17  ;;  %p1037_p3 = scmp.lt.s32.totalorder %s747_s0, %s747_s0 }
 0x57c   :  { %p1038_p4 = scmp.lt.s32.totalorder %s1036_s10, %s1032_s17 }
 0x57e   :  { %p1039_p5 = por %p1038_p4, %p1037_p3 }
 0x580   :  { %p1040_p6 = pnand %p1039_p5, %p1033_p2 }
 0x582   :  { %1043 = shalt.err (!%p1040_p6)
}
 0x583   :  { %749 = dma.vmem_to_hbm [thread:$0]  %s747_s0, 16, %s1300_s11, [#allocation18]   ;;  %v654_v36 = vmul.f32 1.442695, %v653_v12  ;;  %v652_v38 = vld [vmem:[#allocation4] sm:$0x1] }
 0x584   :  { %s1123_s7 = smov [#allocation14]   ;;  %s1124_s3 = smov [#allocation16]   ;;  %v694_v45 = vld [vmem:[#allocation3] sm:$0x1] }
 0x585   :  { %908 = vpow2.f32 %v654_v36  ;;  %s716_s20 = sshll.u32 %s1123_s7, 4  ;;  %s726_s11 = sshll.u32 %s1124_s3, 4  ;;  %s717_s20 = int_to_ptr.vmem [resolvable:$true] %s716_s20  ;;  %s727_s11 = int_to_ptr.vmem [resolvable:$true] %s726_s11 }
 0x586   :  { %s1052_s5 = scalar_lea.vmem %s717_s20, 16  ;;  %s1056_s2 = scalar_lea.vmem %s717_s20, 32 }
 0x587   :  { %p1053_p7 = scmp.ne.s32.totalorder %s717_s20, %s1052_s5  ;;  %p1057_p8 = scmp.lt.s32.totalorder %s717_s20, %s717_s20 }
 0x588   :  { %p1058_p9 = scmp.lt.s32.totalorder %s1056_s2, %s1052_s5 }
 0x58a   :  { %p1059_p10 = por %p1058_p9, %p1057_p8 }
 0x58c   :  { %p1060_p11 = pnand %p1059_p10, %p1053_p7 }
 0x592   :  { %v909_v37 = vpop.eup %908 }
 0x593   :  { %v656_v39 = vmul.f32 %v909_v37, %v652_v38 }
 0x5f3   :  { %v686_v40 = vpop.xlane.xlu0 %685 }
 0x5f4   :  { %v687_v41 = vadd.f32 %v686_v40, %v656_v39 }
 0x5f6   :  { %689 = vst.msk [vmem:[#allocation4] sm:$0x1] %vm398_vm0, %v687_v41 }
 0x5fd   :  { %v695_v42 = vld [vmem:[#allocation4] sm:$0x1] }
 0x5fe   :  { %910 = vlog2.f32 %v695_v42 }
 0x60b   :  { %v911_v43 = vpop.eup %910 }
 0x60c   :  { %v697_v44 = vmul.f32 0.6931472, %v911_v43 }
 0x60e   :  { %v698_v46 = vadd.f32 %v697_v44, %v694_v45 }
 0x610   :  { %699 = vst.msk [vmem:[#allocation14] sm:$0x1] %vm398_vm0, %v698_v46 }
 0x611   :  { %1063 = shalt.err (!%p1060_p11)
}
 0x612   :  { %719 = dma.vmem_to_hbm [thread:$0]  %s717_s20, 16, %s1297_s8, [#allocation15]  }
 0x613   :  { %s1072_s23 = scalar_lea.vmem %s727_s11, 16  ;;  %s1076_s4 = scalar_lea.vmem %s727_s11, 32 }
 0x614   :  { %p1073_p12 = scmp.ne.s32.totalorder %s727_s11, %s1072_s23  ;;  %p1077_p13 = scmp.lt.s32.totalorder %s727_s11, %s727_s11 }
 0x615   :  { %p1078_p0 = scmp.lt.s32.totalorder %s1076_s4, %s1072_s23 }
 0x617   :  { %p1079_p1 = por %p1078_p0, %p1077_p13 }
 0x619   :  { %p1080_p2 = pnand %p1079_p1, %p1073_p12 }
 0x61b   :  { %1083 = shalt.err (!%p1080_p2)
}
 0x61c   :  { %729 = dma.vmem_to_hbm [thread:$0]  %s727_s11, 16, %s1298_s9, [#allocation15]  }
 0x61d   :  { %1098 = dma.done.wait [#allocation7], 64  }
 0x61e   :  { %1099 = vsyncadd [#allocation7], 4294967232 }
 0x61f   :  { %1100 = dma.done.wait [#allocation15], 32  }
 0x620   :  { %1101 = vsyncadd [#allocation15], 4294967264 }
 0x621   :  { %1102 = dma.done.wait [#allocation18], 32  }
 0x622   :  { %1103 = vsyncadd [#allocation18], 4294967264 }
 0x623   :  { %765 = vsyncpa [#allocation6], 1 }
 0x624   :  { %766 = vsyncpa [#allocation9], 1 }
 0x625   :  { %767 = vsyncpa [#allocation12], 1 }
 0x626   :  { %768 = vsyncpa [#allocation7], 1 }
 0x627   :  { %769 = vsyncpa [#allocation15], 1 }
 0x628   :  { %770 = vsyncpa [#allocation18], 1 }

</bundles_post_ra>
